<compile_context>
chip_gen: v7x
topology: tpu7x:2x2x1
jax: 0.10.0
libtpu: 0.0.40
codegen_flags: <defaults>
</compile_context>

<pallas_src>
import functools

import jax
import jax.numpy as jnp
from jax.experimental import pallas as pl
from jax.experimental.pallas import tpu as pltpu

_MIB = 1024 * 1024


# ----------------------------------------------------------------------------- config
def _vmem_capacity_bytes() -> int:
    """Physical VMEM per core; conservative 64 MiB (v7x) fallback if unqueryable."""
    try:
        cap = getattr(pltpu.get_tpu_info(), "vmem_capacity_bytes", None)
        if cap:
            return int(cap)
    except Exception:
        pass
    return 64 * _MIB


def _choose_tk(K: int) -> int:
    """K tile: full K when it fits comfortably, else a 128-aligned divisor <= 2048
    (divisor => no partial blocks on the reduction axis => no OOB garbage in the acc)."""
    if K <= 8192:
        return K
    for tk in range(2048, 255, -128):
        if K % tk == 0:
            return tk
    return K  # odd K: fall back to un-tiled; the VMEM clamp below still applies


def _prepass_tile(M: int, K: int, in_itemsize: int, vmem_cap: int) -> int:
    budget = min(24 * _MIB, (vmem_cap * 2) // 5)
    per_row = 2 * K * (in_itemsize + 2) + 2 * 4 + 8  # dbl-buffered x in + q out + s out
    tm = 256
    while tm > 16 and tm * per_row > budget:
        tm //= 2
    return M if M <= tm else tm


def _matmul_config(M, N, K, tk, out_itemsize, vmem_cap):
    # Bigger token tiles on 128 MiB parts (v5e/v6e) -> fewer full-weight re-streams.
    tm = 512 if vmem_cap >= 96 * _MIB else 256
    tn = 256
    kt = K // tk
    budget = (vmem_cap * 11) // 20  # ~55% of physical: headroom for compiler scratch

    def footprint(tm_, tn_):
        f = 2 * tm_ * tk * 2                 # quant-level blocks (bf16, double-buffered)
        f += 2 * tk * tn_ * 2                # weight slab (bf16, double-buffered)
        f += 2 * tm_ * tn_ * out_itemsize    # output tile
        f += 2 * (tm_ * 4 + tn_ * 4)         # per-token scales + f32 bias
        if kt > 1:
            f += tm_ * tn_ * 4               # f32 accumulator scratch
        return f

    while footprint(tm, tn) > budget and tm > 64:
        tm //= 2
    while footprint(tm, tn) > budget and tn > 128:
        tn //= 2
    tm = M if M <= tm else tm
    tn = N if N <= tn else tn
    vmem_limit = min((vmem_cap * 3) // 4, max(2 * footprint(tm, tn), 32 * _MIB))
    return tm, tn, kt, vmem_limit


# ----------------------------------------------------------------------------- kernels
def _act_quant_kernel(x_ref, q_ref, s_ref, *, a_bit):
    """Per-token symmetric fake-quant pre-pass: bf16 integer levels + f32 scales."""
    x = x_ref[...].astype(jnp.float32)                     # (tm_q, K)
    q_max = 2.0 ** (a_bit - 1) - 1.0
    absmax = jnp.max(jnp.abs(x), axis=-1, keepdims=True)   # (tm_q, 1)
    scales = jnp.maximum(absmax, 1e-5) * (1.0 / q_max)     # clamp(min=1e-5) / q_max
    inv = 1.0 / scales                                     # exact per-row reciprocal
    q_ref[...] = jnp.round(x * inv).astype(jnp.bfloat16)   # |level| <= 127: exact in bf16
    s_ref[...] = scales


def _matmul_kernel(q_ref, wt_ref, s_ref, b_ref, o_ref):
    """Un-tiled-K path: one bf16xbf16->f32 MXU matmul + scale/bias epilogue per tile."""
    y = jnp.dot(q_ref[...], wt_ref[...], preferred_element_type=jnp.float32)
    o_ref[...] = (y * s_ref[...] + b_ref[...]).astype(o_ref.dtype)


def _matmul_acc_kernel(q_ref, wt_ref, s_ref, b_ref, o_ref, acc_ref):
    """K-tiled path: f32 accumulator scratch, scale/bias epilogue on the last k step."""
    k = pl.program_id(2)

    @pl.when(k == 0)
    def _():
        acc_ref[...] = jnp.zeros_like(acc_ref)

    acc_ref[...] += jnp.dot(q_ref[...], wt_ref[...], preferred_element_type=jnp.float32)

    @pl.when(k == pl.num_programs(2) - 1)
    def _():
        o_ref[...] = (acc_ref[...] * s_ref[...] + b_ref[...]).astype(o_ref.dtype)


# ----------------------------------------------------------------------------- wrappers
def prepare_quantized_linear_params(weight, bias=None):
    """One-time (weight-load-time) layout prep: W (out,in) -> bf16 (in,out), bias -> f32 (1,out)."""
    out_features, _ = weight.shape
    wt = jnp.asarray(weight, jnp.bfloat16).T  # (K, N): lane-dense MXU RHS, transposed ONCE
    if bias is None:
        b = jnp.zeros((1, out_features), jnp.float32)
    else:
        b = jnp.asarray(bias, jnp.float32).reshape(1, out_features)
    return wt, b


@functools.partial(jax.jit, static_argnames=("a_bit",))
def quantized_linear_prepared(x, wt, bias_f32, a_bit=8):
    """x: (..., K); wt: (K, N) bf16 from prepare_...; bias_f32: (1, N) f32."""
    orig_dtype = x.dtype
    *lead, K = x.shape
    Kw, N = wt.shape
    assert Kw == K, (Kw, K)

    # f32/bf16 flow straight through; other dtypes (e.g. f16) are ingested as bf16 and
    # the output is stored f32 so only a single final rounding to the caller's dtype remains.
    # TODO(synk): ingest/store float16 directly in-kernel instead of via bf16/f32.
    if orig_dtype == jnp.float32 or orig_dtype == jnp.bfloat16:
        x_in = x.reshape(-1, K)
        out_dtype, out_itemsize, cast_back = orig_dtype, x.dtype.itemsize, False
    else:
        x_in = x.reshape(-1, K).astype(jnp.bfloat16)
        out_dtype, out_itemsize, cast_back = jnp.float32, 4, True
    M = x_in.shape[0]

    vmem_cap = _vmem_capacity_bytes()

    # ---- pass 1: per-token quant (memory-bound; hoisted out of the matmul) -------------
    tm_q = _prepass_tile(M, K, x_in.dtype.itemsize, vmem_cap)
    q_levels, scales = pl.pallas_call(
        functools.partial(_act_quant_kernel, a_bit=a_bit),
        out_shape=(
            jax.ShapeDtypeStruct((M, K), jnp.bfloat16),
            jax.ShapeDtypeStruct((M, 1), jnp.float32),
        ),
        grid_spec=pltpu.PrefetchScalarGridSpec(
            num_scalar_prefetch=0,
            grid=(pl.cdiv(M, tm_q),),
            in_specs=[pl.BlockSpec((tm_q, K), lambda i: (i, 0))],
            out_specs=[
                pl.BlockSpec((tm_q, K), lambda i: (i, 0)),
                pl.BlockSpec((tm_q, 1), lambda i: (i, 0)),
            ],
        ),
        compiler_params=pltpu.CompilerParams(
            dimension_semantics=("parallel",),
            vmem_limit_bytes=min((vmem_cap * 3) // 4, 48 * _MIB),
        ),
    )(x_in)

    # ---- pass 2: levels @ W^T with scale/bias epilogue ---------------------------------
    tk = _choose_tk(K)
    tm, tn, kt, vmem_limit = _matmul_config(M, N, K, tk, out_itemsize, vmem_cap)
    grid_mn = (pl.cdiv(M, tm), pl.cdiv(N, tn))

    if kt == 1:
        kernel = _matmul_kernel
        grid_spec = pltpu.PrefetchScalarGridSpec(
            num_scalar_prefetch=0,
            grid=grid_mn,
            in_specs=[
                pl.BlockSpec((tm, K), lambda i, j: (i, 0)),   # bf16 quant levels
                pl.BlockSpec((K, tn), lambda i, j: (0, j)),   # pre-transposed weight slab
                pl.BlockSpec((tm, 1), lambda i, j: (i, 0)),   # per-token scales (f32)
                pl.BlockSpec((1, tn), lambda i, j: (0, j)),   # bias (f32)
            ],
            out_specs=pl.BlockSpec((tm, tn), lambda i, j: (i, j)),
        )
        semantics = ("parallel", "parallel")                  # both axes feed v7x megacore
    else:
        kernel = _matmul_acc_kernel
        grid_spec = pltpu.PrefetchScalarGridSpec(
            num_scalar_prefetch=0,
            grid=grid_mn + (kt,),
            in_specs=[
                pl.BlockSpec((tm, tk), lambda i, j, k: (i, k)),
                pl.BlockSpec((tk, tn), lambda i, j, k: (k, j)),
                pl.BlockSpec((tm, 1), lambda i, j, k: (i, 0)),
                pl.BlockSpec((1, tn), lambda i, j, k: (0, j)),
            ],
            out_specs=pl.BlockSpec((tm, tn), lambda i, j, k: (i, j)),
            scratch_shapes=[pltpu.VMEM((tm, tn), jnp.float32)],
        )
        semantics = ("parallel", "parallel", "arbitrary")

    out = pl.pallas_call(
        kernel,
        out_shape=jax.ShapeDtypeStruct((M, N), out_dtype),
        grid_spec=grid_spec,
        compiler_params=pltpu.CompilerParams(
            dimension_semantics=semantics,
            vmem_limit_bytes=vmem_limit,
        ),
    )(q_levels, wt, scales, bias_f32)

    out = out.reshape(*lead, N)
    if cast_back:
        out = out.astype(orig_dtype)
    return out


def quantized_linear(x, weight, bias=None, *, a_bit=8):
    """Convenience wrapper (re-prepares the weight layout every call; prefer
    prepare_quantized_linear_params + quantized_linear_prepared in real use)."""
    wt, b = prepare_quantized_linear_params(weight, bias)
    return quantized_linear_prepared(x, wt, b, a_bit=a_bit)


# ----------------------------------------------------------------------------- reference
def _reference(x, weight, bias, a_bit=8):
    """Pure-JAX f32 reference of the PyTorch forward (per_token symmetric act quant)."""
    xf = x.astype(jnp.float32)
    q_max = 2.0 ** (a_bit - 1) - 1.0
    scales = jnp.maximum(jnp.max(jnp.abs(xf), axis=-1, keepdims=True), 1e-5) / q_max
    q_x = jnp.round(xf / scales) * scales
    y = q_x @ weight.astype(jnp.float32).T
    if bias is not None:
        y = y + bias.astype(jnp.float32)
    return y


if __name__ == "__main__":
    key = jax.random.PRNGKey(0)
    k_x, k_w = jax.random.split(key)

    batch, seq = 2, 8
    in_features, out_features = 32, 64

    # Module __init__: weight ~ randn fp16, bias zeros fp16.
    weight = jax.random.normal(k_w, (out_features, in_features), dtype=jnp.float32).astype(jnp.float16)
    bias = jnp.zeros((1, out_features), dtype=jnp.float16)
    x = jax.random.normal(k_x, (batch, seq, in_features), dtype=jnp.float32).astype(jnp.float16)

    # Prepare the weight layout ONCE (feedback: no per-call transpose/pad of W).
    wt, b = prepare_quantized_linear_params(weight, bias)

    y = quantized_linear_prepared(x, wt, b, a_bit=8)
    y = jax.block_until_ready(y)

    assert y.shape == (batch, seq, out_features)
    assert y.dtype == x.dtype

    # Reference on the bf16 view of the activations (the precision the kernel ingests);
    # remaining deviation is only the bf16 weight cast + final f16 store rounding.
    y_ref = _reference(x.astype(jnp.bfloat16), weight, bias, a_bit=8)
    assert jnp.allclose(y.astype(jnp.float32), y_ref, atol=5e-2, rtol=5e-2), \
        float(jnp.max(jnp.abs(y.astype(jnp.float32) - y_ref)))

    print("KERNEL_OK")
</pallas_src>

<mosaic_0001>
module attributes {stable_mosaic.version = 11 : i64} {
  func.func @_matmul_kernel(%arg0: i32, %arg1: i32, %arg2: memref<16x32xbf16, #tpu.memory_space<vmem>>, %arg3: memref<32x64xbf16, #tpu.memory_space<vmem>>, %arg4: memref<16x1xf32, #tpu.memory_space<vmem>>, %arg5: memref<1x64xf32, #tpu.memory_space<vmem>>, %arg6: memref<16x64xf32, #tpu.memory_space<vmem>>) attributes {dimension_semantics = [#tpu.dimension_semantics<parallel>, #tpu.dimension_semantics<parallel>], iteration_bounds = array<i64: 1, 1>, scalar_prefetch = 0 : i64, scratch_operands = 0 : i64, tpu.core_type = #tpu.core_type<tc>, window_params = [{transform_indices = @transform_0, window_bounds = array<i64: 16, 32>}, {transform_indices = @transform_1, window_bounds = array<i64: 32, 64>}, {transform_indices = @transform_2, window_bounds = array<i64: 16, 1>}, {transform_indices = @transform_3, window_bounds = array<i64: 1, 64>}, {transform_indices = @transform_4, window_bounds = array<i64: 16, 64>}]} {
    %c0 = arith.constant 0 : index
    %c0_0 = arith.constant 0 : index
    %0 = vector.load %arg2[%c0, %c0_0] : memref<16x32xbf16, #tpu.memory_space<vmem>>, vector<16x32xbf16>
    %c0_1 = arith.constant 0 : index
    %c0_2 = arith.constant 0 : index
    %1 = vector.load %arg3[%c0_1, %c0_2] : memref<32x64xbf16, #tpu.memory_space<vmem>>, vector<32x64xbf16>
    %cst = arith.constant dense<0.000000e+00> : vector<16x64xf32>
    %2 = tpu.matmul %0, %1, %cst {dimension_numbers = #tpu.dot_dimension_numbers<[1], [0], [0], [1], [0, 0, 1, 1], [], []>} : vector<16x32xbf16>, vector<32x64xbf16>, vector<16x64xf32> -> vector<16x64xf32>
    %c0_3 = arith.constant 0 : index
    %c0_4 = arith.constant 0 : index
    %3 = vector.load %arg4[%c0_3, %c0_4] : memref<16x1xf32, #tpu.memory_space<vmem>>, vector<16x1xf32>
    %4 = vector.broadcast %3 : vector<16x1xf32> to vector<16x64xf32>
    %5 = arith.mulf %2, %4 : vector<16x64xf32>
    %c0_5 = arith.constant 0 : index
    %c0_6 = arith.constant 0 : index
    %6 = vector.load %arg5[%c0_5, %c0_6] : memref<1x64xf32, #tpu.memory_space<vmem>>, vector<1x64xf32>
    %7 = vector.broadcast %6 : vector<1x64xf32> to vector<16x64xf32>
    %8 = arith.addf %5, %7 : vector<16x64xf32>
    %c0_7 = arith.constant 0 : index
    %c0_8 = arith.constant 0 : index
    %9 = vector.load %arg6[%c0_7, %c0_8] : memref<16x64xf32, #tpu.memory_space<vmem>>, vector<16x64xf32>
    tpu.vector_store %arg6[%c0_7, %c0_8], %8 {strides = array<i32>} : memref<16x64xf32, #tpu.memory_space<vmem>>, vector<16x64xf32>,
    return
  }
  func.func @transform_0(%arg0: i32, %arg1: i32) -> (i32, i32) {
    %c0_i32 = arith.constant 0 : i32
    %c0_i32_0 = arith.constant 0 : i32
    return %arg0, %c0_i32 : i32, i32
  }
  func.func @transform_1(%arg0: i32, %arg1: i32) -> (i32, i32) {
    %c0_i32 = arith.constant 0 : i32
    %c0_i32_0 = arith.constant 0 : i32
    return %c0_i32, %arg1 : i32, i32
  }
  func.func @transform_2(%arg0: i32, %arg1: i32) -> (i32, i32) {
    %c0_i32 = arith.constant 0 : i32
    %c0_i32_0 = arith.constant 0 : i32
    return %arg0, %c0_i32 : i32, i32
  }
  func.func @transform_3(%arg0: i32, %arg1: i32) -> (i32, i32) {
    %c0_i32 = arith.constant 0 : i32
    %c0_i32_0 = arith.constant 0 : i32
    return %c0_i32, %arg1 : i32, i32
  }
  func.func @transform_4(%arg0: i32, %arg1: i32) -> (i32, i32) {
    %c0_i32 = arith.constant 0 : i32
    return %arg0, %arg1 : i32, i32
  }
}

module attributes {stable_mosaic.version = 11 : i64} {
  func.func @_act_quant_kernel(%arg0: i32, %arg1: memref<16x32xbf16, #tpu.memory_space<vmem>>, %arg2: memref<16x32xbf16, #tpu.memory_space<vmem>>, %arg3: memref<16x1xf32, #tpu.memory_space<vmem>>) attributes {dimension_semantics = [#tpu.dimension_semantics<parallel>], iteration_bounds = array<i64: 1>, scalar_prefetch = 0 : i64, scratch_operands = 0 : i64, tpu.core_type = #tpu.core_type<tc>, window_params = [{transform_indices = @transform_0, window_bounds = array<i64: 16, 32>}, {transform_indices = @transform_1, window_bounds = array<i64: 16, 32>}, {transform_indices = @transform_2, window_bounds = array<i64: 16, 1>}]} {
    %c0 = arith.constant 0 : index
    %c0_0 = arith.constant 0 : index
    %0 = vector.load %arg1[%c0, %c0_0] : memref<16x32xbf16, #tpu.memory_space<vmem>>, vector<16x32xbf16>
    %1 = arith.extf %0 : vector<16x32xbf16> to vector<16x32xf32>
    %2 = math.absf %1 : vector<16x32xf32>
    %cst = arith.constant dense<0xFF800000> : vector<16xf32>
    %3 = vector.multi_reduction <maximumf>, %2, %cst [1] : vector<16x32xf32> to vector<16xf32>
    %4 = vector.shape_cast %3 : vector<16xf32> to vector<16x1xf32>
    %cst_1 = arith.constant 9.99999974E-6 : f32
    %5 = vector.broadcast %cst_1 : f32 to vector<16x1xf32>
    %6 = arith.maximumf %4, %5 : vector<16x1xf32>
    %cst_2 = arith.constant 0.00787401571 : f32
    %7 = vector.broadcast %cst_2 : f32 to vector<16x1xf32>
    %8 = arith.mulf %6, %7 : vector<16x1xf32>
    %cst_3 = arith.constant 1.000000e+00 : f32
    %9 = vector.broadcast %cst_3 : f32 to vector<16x1xf32>
    %10 = arith.divf %9, %8 : vector<16x1xf32>
    %11 = vector.broadcast %10 : vector<16x1xf32> to vector<16x32xf32>
    %12 = arith.mulf %1, %11 : vector<16x32xf32>
    %13 = math.roundeven %12 : vector<16x32xf32>
    %14 = arith.truncf %13 : vector<16x32xf32> to vector<16x32xbf16>
    %c0_4 = arith.constant 0 : index
    %c0_5 = arith.constant 0 : index
    %15 = vector.load %arg2[%c0_4, %c0_5] : memref<16x32xbf16, #tpu.memory_space<vmem>>, vector<16x32xbf16>
    tpu.vector_store %arg2[%c0_4, %c0_5], %14 {strides = array<i32>} : memref<16x32xbf16, #tpu.memory_space<vmem>>, vector<16x32xbf16>,
    %c0_6 = arith.constant 0 : index
    %c0_7 = arith.constant 0 : index
    %16 = vector.load %arg3[%c0_6, %c0_7] : memref<16x1xf32, #tpu.memory_space<vmem>>, vector<16x1xf32>
    tpu.vector_store %arg3[%c0_6, %c0_7], %8 {strides = array<i32>} : memref<16x1xf32, #tpu.memory_space<vmem>>, vector<16x1xf32>,
    return
  }
  func.func @transform_0(%arg0: i32) -> (i32, i32) {
    %c0_i32 = arith.constant 0 : i32
    %c0_i32_0 = arith.constant 0 : i32
    return %arg0, %c0_i32 : i32, i32
  }
  func.func @transform_1(%arg0: i32) -> (i32, i32) {
    %c0_i32 = arith.constant 0 : i32
    %c0_i32_0 = arith.constant 0 : i32
    return %arg0, %c0_i32 : i32, i32
  }
  func.func @transform_2(%arg0: i32) -> (i32, i32) {
    %c0_i32 = arith.constant 0 : i32
    %c0_i32_0 = arith.constant 0 : i32
    return %arg0, %c0_i32 : i32, i32
  }
}

</mosaic_0001>

<bundles_post_ra>
// kernel: quantized_linear_prepared.3
= control target key start
LH: loop header
LB: loop body
LE: loop exit
PB: predicated region body
PF: predicated region fallthrough
CT: control target
= control target key end

     0   :  { %v139_v0 = vmov 0.0   ;;  %vm140_vm0 = vmmov 0   ;;  %v141_v2 = vmov 0   ;;  %vm41_vm1 = vcmask 261120   ;;  %s191_s1 = inlined_call_operand.vmem [shape: bf16[32,64], index: 1, kind: input, shape index: {}]   ;;  %s192_s2 = inlined_call_operand.vmem [shape: f32[16,1], index: 2, kind: input, shape index: {}]   ;;  %s193_s0 = inlined_call_operand.vmem [shape: bf16[16,32], index: 0, kind: input, shape index: {}]   ;;  %s194_s3 = inlined_call_operand.vmem [shape: f32[1,64], index: 3, kind: input, shape index: {}]   ;;  %s195_s4 = inlined_call_operand.vmem [shape: f32[16,64], index: 4, kind: output, shape index: {}]  }
   0x1   :  { %124 = vmatprep.subr.bf16.mxu0 %v139_v0  ;;  %v136_v1 = vld [vmem:[%s191_s1] sm:$0xff]   ;;  %128 = vmatprep.mubr.msk.bf16.mxu0 %vm140_vm0, %v139_v0  ;;  %v137_v3 = vld [vmem:[%s191_s1 + $0x8] sm:$0xff]   ;;  %vm109_vm2 = vcmask 523264  }
   0x2   :  { %135 = vset.pattern.permute.xlu0 %v141_v2  ;;  %125 = vmatpush3.bf16.msra.mxu0 %v136_v1  ;;  %v86_v4 = vld [vmem:[%s192_s2] sm:$0xff]  ;;  %v87_v6 = vld [vmem:[%s192_s2 + $0x8] sm:$0xff] }
   0x3   :  { %126 = vmatprep.subr.bf16.mxu0 %v139_v0  ;;  %90 = vperm.xlu0 %135, %v86_v4   ;;  %v138_v5 = vld [vmem:[%s193_s0] sm:$0xff]  }
   0x4   :  { %v120_v9 = vld [vmem:[%s194_s3] ss:$0 sm:$0xff] }
   0x6   :  { %127 = vmatpush3.bf16.msra.mxu0 %v137_v3 }
   0x7   :  { %95 = vperm.xlu0 %135, %v87_v6  }
   0x9   :  { %129 = vmatmul.mubr.msk.bf16.vlgmr.msra.gmra.mrb[0].mxu0 %vm41_vm1, %v138_v5 }
  0x82   :  { %v91_v7 = vpop.permute.xlu0 %90 }
  0x86   :  { %v96_v12 = vpop.permute.xlu0 %95 }
  0xdc   :  { %v79_v8 = vpop.f32.mrb[0].mxu0 }
  0xdd   :  { %v98_v10 = vmul.f32 %v91_v7, %v79_v8  ;;  %v130_v11 = vpop.f32.mrb[1].mxu0 }
  0xde   :  { %v82_v13 = vpop.f32.mrb[2].mxu0 }
  0xdf   :  { %v107_v14 = vadd.f32 %v120_v9, %v98_v10  ;;  %v99_v15 = vmul.f32 %v96_v12, %v82_v13  ;;  %v131_v16 = vpop.f32.mrb[3].mxu0 }
  0xe1   :  { %110 = vst.msk [vmem:[%s195_s4] sm:$0xff] %vm109_vm2, %v107_v14  ;;  %v108_v17 = vadd.f32 %v120_v9, %v99_v15 }
  0xe3   :  { %111 = vst.msk [vmem:[%s195_s4 + $0x8] sm:$0xff] %vm109_vm2, %v108_v17 }

// kernel: quantized_linear_prepared.2
= control target key start
LH: loop header
LB: loop body
LE: loop exit
PB: predicated region body
PF: predicated region fallthrough
CT: control target
= control target key end

     0   :  { %vm16_vm0 = vcmask 261120   ;;  %vm46_vm1 = vcmask 7168   ;;  %vm43_vm2 = vcmask 257024   ;;  %s101_s0 = inlined_call_operand.vmem [shape: bf16[16,32], index: 0, kind: input, shape index: {}]   ;;  %s102_s2 = inlined_call_operand.vmem [shape: f32[16,1], index: 2, kind: output, shape index: {1}]   ;;  %s103_s1 = inlined_call_operand.vmem [shape: bf16[16,32], index: 1, kind: output, shape index: {0}]  }
   0x1   :  { %v62_v0 = vld [vmem:[%s101_s0] sm:$0xff]  }
   0x2   :  { %v63_v1 = vunpack.c.l.bf16 %v62_v0  ;;  %v64_v2 = vunpack.c.h.bf16 %v62_v0 }
   0x4   :  { %v14_v3 = vand.u32 2147483647, %v63_v1  ;;  %v15_v4 = vand.u32 2147483647, %v64_v2 }
   0x6   :  { %v17_v5 = vsel %vm16_vm0, %v14_v3, -inf  ;;  %v20_v6 = vsel %vm16_vm0, %v15_v4, -inf }
   0x7   :  { %18 = vmax.xlane.f32.xlu0 %v17_v5 }
   0xb   :  { %21 = vmax.xlane.f32.xlu0 %v20_v6 }
  0x94   :  { %v19_v7 = vpop.xlane.xlu0 %18 }
  0x95   :  { %v23_v8 = vmax.f32 %v19_v7, 1e-05 }
  0x97   :  { %v25_v9 = vmul.f32 0.007874016, %v23_v8 }
  0x98   :  { %v22_v10 = vpop.xlane.xlu0 %21 }
  0x99   :  { %67 = vrcp.f32 %v25_v9  ;;  %47 = vst.msk [vmem:[%s102_s2] sm:$0xff] %vm46_vm1, %v25_v9  ;;  %v24_v11 = vmax.f32 %v22_v10, 1e-05 }
  0x9b   :  { %v26_v12 = vmul.f32 0.007874016, %v24_v11 }
  0x9d   :  { %69 = vrcp.f32 %v26_v12  ;;  %48 = vst.msk [vmem:[%s102_s2 + $0x8] sm:$0xff] %vm46_vm1, %v26_v12 }
  0xa3   :  { %v68_v13 = vpop.eup %67 }
  0xa4   :  { %v31_v14 = vmul.f32 %v68_v13, %v63_v1 }
  0xa6   :  { %v65_v15 = vround.rtne.f32 %v31_v14 }
  0xa7   :  { %v70_v16 = vpop.eup %69 }
  0xa8   :  { %v59_v17 = vpack.c.bf16 %v65_v15, %v65_v15  ;;  %v32_v18 = vmul.f32 %v70_v16, %v64_v2 }
  0xaa   :  { %44 = vst.msk [vmem:[%s103_s1] sm:$0xf] %vm43_vm2, %v59_v17  ;;  %v66_v19 = vround.rtne.f32 %v32_v18 }
  0xac   :  { %v60_v20 = vpack.c.bf16 %v66_v19, %v66_v19 }
  0xae   :  { %45 = vst.msk [vmem:[%s103_s1 + $0x4] sm:$0xf] %vm43_vm2, %v60_v20 }

</bundles_post_ra>
